<compile_context>
chip_gen: v5e
topology: v5e:2x2
jax: 0.10.0
libtpu: 0.0.40
codegen_flags: <defaults>
</compile_context>

<pallas_src>
import functools

import numpy as np
import jax
import jax.numpy as jnp
from jax.experimental import pallas as pl
from jax.experimental.pallas import tpu as pltpu


# ---------------------------------------------------------------------------
# MADE mask construction (autoregressive over the C features of each timestep)
# ---------------------------------------------------------------------------
def build_made_masks(C, H):
    m_in = np.arange(1, C + 1)                                    # (C,)
    if C > 1:
        m_hid = (np.arange(H) % (C - 1)) + 1                      # (H,)
    else:
        m_hid = np.ones(H, dtype=np.int64)
    mask1 = (m_hid[None, :] >= m_in[:, None]).astype(np.float32)  # (C, H)
    # output degrees equal input degrees (same mask for mu-head and log_p-head)
    mask2 = (m_in[None, :] > m_hid[:, None]).astype(np.float32)   # (H, C)
    return jnp.asarray(mask1), jnp.asarray(mask2)


# ---------------------------------------------------------------------------
# Pallas kernel: one lane chunk of (batch, timestep) columns per grid step
# ---------------------------------------------------------------------------
def maf_forward_kernel(x_ref, w1t_ref, b1_ref, w2t_ref, b2_ref,
                       u_ref, part_ref, *, C, L):
    xt = x_ref[...]                                   # (C, N) f32, N = lane chunk
    lp_acc = jnp.zeros_like(xt)                       # elementwise 0.5*log_p accum

    # flow layers are sequential -> static python loop (L is small & static)
    for l in range(L):
        # hidden: (H, C) @ (C, N) -> (H, N)   (lane axis = flattened B*T columns)
        h = jnp.dot(w1t_ref[l], xt, preferred_element_type=jnp.float32) + b1_ref[l]
        h = jnp.maximum(h, 0.0)                                           # ReLU
        # fused heads: (2C, H) @ (H, N) -> (2C, N); rows [0:C)=mu, [C:2C)=log_p
        out = jnp.dot(w2t_ref[l], h, preferred_element_type=jnp.float32) + b2_ref[l]
        mu = out[:C, :]                               # sublane-aligned for C % 8 == 0
        lp_half = 0.5 * out[C:, :]
        xt = (xt - mu) * jnp.exp(lp_half)
        lp_acc = lp_acc + lp_half                     # defer reduction (VPU add only)

    u_ref[...] = xt

    # single fused cross-sublane reduce -> per-column log-likelihood partials:
    #   part[col] = sum_c (0.5*sum_l log_p - 0.5*u^2);  the Gaussian constant,
    #   the padding mask and the batch mean are finished in the wrapper.
    part_ref[...] = jnp.sum(lp_acc - 0.5 * xt * xt, axis=0, keepdims=True)


# ---------------------------------------------------------------------------
# Parameter packing (call-invariant glue, done ONCE outside the forward path)
# ---------------------------------------------------------------------------
def pack_maf_params(w1, b1, w2mu, b2mu, w2lp, b2lp):
    # Orientation for columns-on-lanes matmuls and fused (mu | log_p) heads.
    w1t = jnp.transpose(w1, (0, 2, 1)).astype(jnp.float32)                  # (L, H, C)
    b1c = jnp.transpose(b1, (0, 2, 1)).astype(jnp.float32)                  # (L, H, 1)
    w2t = jnp.transpose(jnp.concatenate([w2mu, w2lp], axis=2),
                        (0, 2, 1)).astype(jnp.float32)                      # (L, 2C, H)
    b2c = jnp.transpose(jnp.concatenate([b2mu, b2lp], axis=2),
                        (0, 2, 1)).astype(jnp.float32)                      # (L, 2C, 1)
    return w1t, b1c, w2t, b2c


# ---------------------------------------------------------------------------
# Wrapper: lane-dense layout + pallas_call + masked NLL finish
# ---------------------------------------------------------------------------
def maf_forward(x, w1t, b1c, w2t, b2c):
    # x: (B, C, T) float32  (PyTorch convention)
    B, C, T = x.shape
    L, H, _ = w1t.shape

    # Lane-dense slab: (C, B*T) with the flattened column axis on lanes.
    n_cols = B * T
    x_flat = jnp.transpose(x, (1, 0, 2)).reshape(C, n_cols).astype(jnp.float32)

    # Chunk the column axis: single step if it fits in 512 lanes, else 512-wide
    # chunks (>=2 chunks shard across v7x's two TensorCores via "parallel").
    if n_cols <= 512:
        chunk = max(128, ((n_cols + 127) // 128) * 128)
    else:
        chunk = 512
    n_pad = ((n_cols + chunk - 1) // chunk) * chunk
    if n_pad != n_cols:
        x_flat = jnp.pad(x_flat, ((0, 0), (0, n_pad - n_cols)))
    grid = n_pad // chunk

    kernel = functools.partial(maf_forward_kernel, C=C, L=L)

    u_flat, part = pl.pallas_call(
        kernel,
        out_shape=(jax.ShapeDtypeStruct((C, n_pad), jnp.float32),
                   jax.ShapeDtypeStruct((1, n_pad), jnp.float32)),
        grid=(grid,),
        in_specs=[
            pl.BlockSpec((C, chunk), lambda i: (0, i)),       # lane-dense x chunk
            pl.BlockSpec((L, H, C), lambda i: (0, 0, 0)),     # weights: constant
            pl.BlockSpec((L, H, 1), lambda i: (0, 0, 0)),     # index => no re-DMA
            pl.BlockSpec((L, 2 * C, H), lambda i: (0, 0, 0)),
            pl.BlockSpec((L, 2 * C, 1), lambda i: (0, 0, 0)),
        ],
        out_specs=(
            pl.BlockSpec((C, chunk), lambda i: (0, i)),       # lane-dense u chunk
            pl.BlockSpec((1, chunk), lambda i: (0, i)),       # per-column ll partials
        ),
        compiler_params=pltpu.CompilerParams(
            dimension_semantics=("parallel",)),
    )(x_flat, w1t, b1c, w2t, b2c)

    # Back to the (B, C, T) PyTorch layout (one transpose outside the kernel).
    u = jnp.transpose(u_flat[:, :n_cols].reshape(C, B, T), (1, 0, 2))

    # Masked NLL finish: padded columns MUST be excluded (bias adds make log_p
    # nonzero there even though x was zero-padded).
    col_mask = (jnp.arange(n_pad) < n_cols).astype(jnp.float32)
    total = jnp.sum(part[0] * col_mask)               # sum_b (log_det_b - 0.5*sum u_b^2)
    const = jnp.float32(-0.5 * C * T * np.log(2.0 * np.pi))
    nll = -(const + total / B)
    return u, nll


# ---------------------------------------------------------------------------
# Pure-JAX reference (mirrors the PyTorch MAF.forward semantics)
# ---------------------------------------------------------------------------
def maf_reference(x, w1, b1, w2mu, b2mu, w2lp, b2lp):
    B, C, T = x.shape
    L = w1.shape[0]
    u = jnp.transpose(x, (0, 2, 1))                          # (B, T, C)
    log_det_sum = jnp.zeros((B,), jnp.float32)
    for l in range(L):
        h = jnp.maximum(jnp.einsum('btc,ch->bth', u, w1[l]) + b1[l][0], 0.0)
        mu = jnp.einsum('bth,hc->btc', h, w2mu[l]) + b2mu[l][0]
        log_p = jnp.einsum('bth,hc->btc', h, w2lp[l]) + b2lp[l][0]
        u = (u - mu) * jnp.exp(0.5 * log_p)
        log_det_sum = log_det_sum + 0.5 * jnp.sum(log_p, axis=(1, 2))
    output = jnp.transpose(u, (0, 2, 1))                     # (B, C, T)
    ll = (-(0.5 * C * T * np.log(2.0 * np.pi))
          - 0.5 * jnp.sum(output ** 2, axis=(1, 2)) + log_det_sum)
    return output, -jnp.mean(ll)


# ---------------------------------------------------------------------------
# Main
# ---------------------------------------------------------------------------
if __name__ == "__main__":
    # small shapes consistent with MAF: input_size = (T, C), n_layers flows
    B, C, T = 2, 8, 16          # batch, features (notes), sequence
    H = 32                       # hidden_sizes -> single hidden layer of 32
    L = 3                        # n_layers
    num_genres = 0               # genres conditioning disabled

    key = jax.random.PRNGKey(0)
    kx, kw = jax.random.split(key)
    x = jax.random.normal(kx, (B, C, T), dtype=jnp.float32)

    mask1, mask2 = build_made_masks(C, H)

    # deterministic per-layer MADE parameters; masks pre-applied to weights
    w1_l, b1_l, w2mu_l, b2mu_l, w2lp_l, b2lp_l = [], [], [], [], [], []
    for l in range(L):
        k = jax.random.fold_in(kw, l)
        k1, k2, k3, k4, k5, k6 = jax.random.split(k, 6)
        w1_l.append((jax.random.normal(k1, (C, H)) * (0.3 / np.sqrt(C))) * mask1)
        b1_l.append(jax.random.normal(k2, (1, H)) * 0.01)
        w2mu_l.append((jax.random.normal(k3, (H, C)) * (0.3 / np.sqrt(H))) * mask2)
        b2mu_l.append(jax.random.normal(k4, (1, C)) * 0.01)
        w2lp_l.append((jax.random.normal(k5, (H, C)) * (0.3 / np.sqrt(H))) * mask2)
        b2lp_l.append(jax.random.normal(k6, (1, C)) * 0.01)

    w1 = jnp.stack(w1_l).astype(jnp.float32)        # (L, C, H)
    b1 = jnp.stack(b1_l).astype(jnp.float32)        # (L, 1, H)
    w2mu = jnp.stack(w2mu_l).astype(jnp.float32)    # (L, H, C)
    b2mu = jnp.stack(b2mu_l).astype(jnp.float32)    # (L, 1, C)
    w2lp = jnp.stack(w2lp_l).astype(jnp.float32)    # (L, H, C)
    b2lp = jnp.stack(b2lp_l).astype(jnp.float32)    # (L, 1, C)

    # Pack params ONCE (call-invariant); forward path is jitted around the kernel.
    packed = pack_maf_params(w1, b1, w2mu, b2mu, w2lp, b2lp)
    packed = jax.block_until_ready(packed)
    maf_forward_jit = jax.jit(maf_forward)

    out, nll = maf_forward_jit(x, *packed)
    out = jax.block_until_ready(out)
    nll = jax.block_until_ready(nll)

    ref_out, ref_nll = maf_reference(x, w1, b1, w2mu, b2mu, w2lp, b2lp)
    ref_out = jax.block_until_ready(ref_out)
    ref_nll = jax.block_until_ready(ref_nll)

    assert out.shape == (B, C, T)
    np.testing.assert_allclose(np.asarray(out), np.asarray(ref_out),
                               rtol=1e-4, atol=1e-4)
    np.testing.assert_allclose(float(nll), float(ref_nll), rtol=1e-4, atol=1e-4)

    print("KERNEL_OK")
</pallas_src>

<mosaic_0001>
module attributes {stable_mosaic.version = 11 : i64} {
  func.func @maf_forward_kernel(%arg0: i32, %arg1: memref<8x128xf32, #tpu.memory_space<vmem>>, %arg2: memref<3x32x8xf32, #tpu.memory_space<vmem>>, %arg3: memref<3x32x1xf32, #tpu.memory_space<vmem>>, %arg4: memref<3x16x32xf32, #tpu.memory_space<vmem>>, %arg5: memref<3x16x1xf32, #tpu.memory_space<vmem>>, %arg6: memref<8x128xf32, #tpu.memory_space<vmem>>, %arg7: memref<1x128xf32, #tpu.memory_space<vmem>>) attributes {dimension_semantics = [#tpu.dimension_semantics<parallel>], iteration_bounds = array<i64: 1>, scalar_prefetch = 0 : i64, scratch_operands = 0 : i64, tpu.core_type = #tpu.core_type<tc>, window_params = [{transform_indices = @transform_0, window_bounds = array<i64: 8, 128>}, {pipeline_mode = #tpu.pipeline_mode<synchronous>, transform_indices = @transform_1, window_bounds = array<i64: 3, 32, 8>}, {pipeline_mode = #tpu.pipeline_mode<synchronous>, transform_indices = @transform_2, window_bounds = array<i64: 3, 32, 1>}, {pipeline_mode = #tpu.pipeline_mode<synchronous>, transform_indices = @transform_3, window_bounds = array<i64: 3, 16, 32>}, {pipeline_mode = #tpu.pipeline_mode<synchronous>, transform_indices = @transform_4, window_bounds = array<i64: 3, 16, 1>}, {transform_indices = @transform_5, window_bounds = array<i64: 8, 128>}, {transform_indices = @transform_6, window_bounds = array<i64: 1, 128>}]} {
    %c0 = arith.constant 0 : index
    %c0_0 = arith.constant 0 : index
    %0 = vector.load %arg1[%c0, %c0_0] : memref<8x128xf32, #tpu.memory_space<vmem>>, vector<8x128xf32>
    %cst = arith.constant 0.000000e+00 : f32
    %1 = vector.broadcast %cst : f32 to vector<8x128xf32>
    %c0_1 = arith.constant 0 : index
    %c0_2 = arith.constant 0 : index
    %c0_3 = arith.constant 0 : index
    %2 = vector.load %arg2[%c0_1, %c0_2, %c0_3] : memref<3x32x8xf32, #tpu.memory_space<vmem>>, vector<1x32x8xf32>
    %3 = vector.shape_cast %2 : vector<1x32x8xf32> to vector<32x8xf32>
    %cst_4 = arith.constant dense<0.000000e+00> : vector<32x128xf32>
    %4 = tpu.matmul %3, %0, %cst_4 {dimension_numbers = #tpu.dot_dimension_numbers<[1], [0], [0], [1], [0, 0, 1, 1], [], []>} : vector<32x8xf32>, vector<8x128xf32>, vector<32x128xf32> -> vector<32x128xf32>
    %c0_5 = arith.constant 0 : index
    %c0_6 = arith.constant 0 : index
    %c0_7 = arith.constant 0 : index
    %5 = vector.load %arg3[%c0_5, %c0_6, %c0_7] : memref<3x32x1xf32, #tpu.memory_space<vmem>>, vector<1x32x1xf32>
    %6 = vector.shape_cast %5 : vector<1x32x1xf32> to vector<32x1xf32>
    %7 = vector.broadcast %6 : vector<32x1xf32> to vector<32x128xf32>
    %8 = arith.addf %4, %7 : vector<32x128xf32>
    %cst_8 = arith.constant 0.000000e+00 : f32
    %9 = vector.broadcast %cst_8 : f32 to vector<32x128xf32>
    %10 = arith.maximumf %8, %9 : vector<32x128xf32>
    %c0_9 = arith.constant 0 : index
    %c0_10 = arith.constant 0 : index
    %c0_11 = arith.constant 0 : index
    %11 = vector.load %arg4[%c0_9, %c0_10, %c0_11] : memref<3x16x32xf32, #tpu.memory_space<vmem>>, vector<1x16x32xf32>
    %12 = vector.shape_cast %11 : vector<1x16x32xf32> to vector<16x32xf32>
    %cst_12 = arith.constant dense<0.000000e+00> : vector<16x128xf32>
    %13 = tpu.matmul %12, %10, %cst_12 {dimension_numbers = #tpu.dot_dimension_numbers<[1], [0], [0], [1], [0, 0, 1, 1], [], []>} : vector<16x32xf32>, vector<32x128xf32>, vector<16x128xf32> -> vector<16x128xf32>
    %c0_13 = arith.constant 0 : index
    %c0_14 = arith.constant 0 : index
    %c0_15 = arith.constant 0 : index
    %14 = vector.load %arg5[%c0_13, %c0_14, %c0_15] : memref<3x16x1xf32, #tpu.memory_space<vmem>>, vector<1x16x1xf32>
    %15 = vector.shape_cast %14 : vector<1x16x1xf32> to vector<16x1xf32>
    %16 = vector.broadcast %15 : vector<16x1xf32> to vector<16x128xf32>
    %17 = arith.addf %13, %16 : vector<16x128xf32>
    %18 = vector.extract_strided_slice %17 {offsets = [0, 0], sizes = [8, 128], strides = [1, 1]} : vector<16x128xf32> to vector<8x128xf32>
    %19 = vector.extract_strided_slice %17 {offsets = [8, 0], sizes = [8, 128], strides = [1, 1]} : vector<16x128xf32> to vector<8x128xf32>
    %cst_16 = arith.constant 5.000000e-01 : f32
    %20 = vector.broadcast %cst_16 : f32 to vector<8x128xf32>
    %21 = arith.mulf %20, %19 : vector<8x128xf32>
    %22 = arith.subf %0, %18 : vector<8x128xf32>
    %23 = math.exp %21 : vector<8x128xf32>
    %24 = arith.mulf %22, %23 : vector<8x128xf32>
    %25 = arith.addf %1, %21 : vector<8x128xf32>
    %c1 = arith.constant 1 : index
    %c0_17 = arith.constant 0 : index
    %c0_18 = arith.constant 0 : index
    %26 = vector.load %arg2[%c1, %c0_17, %c0_18] : memref<3x32x8xf32, #tpu.memory_space<vmem>>, vector<1x32x8xf32>
    %27 = vector.shape_cast %26 : vector<1x32x8xf32> to vector<32x8xf32>
    %cst_19 = arith.constant dense<0.000000e+00> : vector<32x128xf32>
    %28 = tpu.matmul %27, %24, %cst_19 {dimension_numbers = #tpu.dot_dimension_numbers<[1], [0], [0], [1], [0, 0, 1, 1], [], []>} : vector<32x8xf32>, vector<8x128xf32>, vector<32x128xf32> -> vector<32x128xf32>
    %c1_20 = arith.constant 1 : index
    %c0_21 = arith.constant 0 : index
    %c0_22 = arith.constant 0 : index
    %29 = vector.load %arg3[%c1_20, %c0_21, %c0_22] : memref<3x32x1xf32, #tpu.memory_space<vmem>>, vector<1x32x1xf32>
    %30 = vector.shape_cast %29 : vector<1x32x1xf32> to vector<32x1xf32>
    %31 = vector.broadcast %30 : vector<32x1xf32> to vector<32x128xf32>
    %32 = arith.addf %28, %31 : vector<32x128xf32>
    %cst_23 = arith.constant 0.000000e+00 : f32
    %33 = vector.broadcast %cst_23 : f32 to vector<32x128xf32>
    %34 = arith.maximumf %32, %33 : vector<32x128xf32>
    %c1_24 = arith.constant 1 : index
    %c0_25 = arith.constant 0 : index
    %c0_26 = arith.constant 0 : index
    %35 = vector.load %arg4[%c1_24, %c0_25, %c0_26] : memref<3x16x32xf32, #tpu.memory_space<vmem>>, vector<1x16x32xf32>
    %36 = vector.shape_cast %35 : vector<1x16x32xf32> to vector<16x32xf32>
    %cst_27 = arith.constant dense<0.000000e+00> : vector<16x128xf32>
    %37 = tpu.matmul %36, %34, %cst_27 {dimension_numbers = #tpu.dot_dimension_numbers<[1], [0], [0], [1], [0, 0, 1, 1], [], []>} : vector<16x32xf32>, vector<32x128xf32>, vector<16x128xf32> -> vector<16x128xf32>
    %c1_28 = arith.constant 1 : index
    %c0_29 = arith.constant 0 : index
    %c0_30 = arith.constant 0 : index
    %38 = vector.load %arg5[%c1_28, %c0_29, %c0_30] : memref<3x16x1xf32, #tpu.memory_space<vmem>>, vector<1x16x1xf32>
    %39 = vector.shape_cast %38 : vector<1x16x1xf32> to vector<16x1xf32>
    %40 = vector.broadcast %39 : vector<16x1xf32> to vector<16x128xf32>
    %41 = arith.addf %37, %40 : vector<16x128xf32>
    %42 = vector.extract_strided_slice %41 {offsets = [0, 0], sizes = [8, 128], strides = [1, 1]} : vector<16x128xf32> to vector<8x128xf32>
    %43 = vector.extract_strided_slice %41 {offsets = [8, 0], sizes = [8, 128], strides = [1, 1]} : vector<16x128xf32> to vector<8x128xf32>
    %cst_31 = arith.constant 5.000000e-01 : f32
    %44 = vector.broadcast %cst_31 : f32 to vector<8x128xf32>
    %45 = arith.mulf %44, %43 : vector<8x128xf32>
    %46 = arith.subf %24, %42 : vector<8x128xf32>
    %47 = math.exp %45 : vector<8x128xf32>
    %48 = arith.mulf %46, %47 : vector<8x128xf32>
    %49 = arith.addf %25, %45 : vector<8x128xf32>
    %c2 = arith.constant 2 : index
    %c0_32 = arith.constant 0 : index
    %c0_33 = arith.constant 0 : index
    %50 = vector.load %arg2[%c2, %c0_32, %c0_33] : memref<3x32x8xf32, #tpu.memory_space<vmem>>, vector<1x32x8xf32>
    %51 = vector.shape_cast %50 : vector<1x32x8xf32> to vector<32x8xf32>
    %cst_34 = arith.constant dense<0.000000e+00> : vector<32x128xf32>
    %52 = tpu.matmul %51, %48, %cst_34 {dimension_numbers = #tpu.dot_dimension_numbers<[1], [0], [0], [1], [0, 0, 1, 1], [], []>} : vector<32x8xf32>, vector<8x128xf32>, vector<32x128xf32> -> vector<32x128xf32>
    %c2_35 = arith.constant 2 : index
    %c0_36 = arith.constant 0 : index
    %c0_37 = arith.constant 0 : index
    %53 = vector.load %arg3[%c2_35, %c0_36, %c0_37] : memref<3x32x1xf32, #tpu.memory_space<vmem>>, vector<1x32x1xf32>
    %54 = vector.shape_cast %53 : vector<1x32x1xf32> to vector<32x1xf32>
    %55 = vector.broadcast %54 : vector<32x1xf32> to vector<32x128xf32>
    %56 = arith.addf %52, %55 : vector<32x128xf32>
    %cst_38 = arith.constant 0.000000e+00 : f32
    %57 = vector.broadcast %cst_38 : f32 to vector<32x128xf32>
    %58 = arith.maximumf %56, %57 : vector<32x128xf32>
    %c2_39 = arith.constant 2 : index
    %c0_40 = arith.constant 0 : index
    %c0_41 = arith.constant 0 : index
    %59 = vector.load %arg4[%c2_39, %c0_40, %c0_41] : memref<3x16x32xf32, #tpu.memory_space<vmem>>, vector<1x16x32xf32>
    %60 = vector.shape_cast %59 : vector<1x16x32xf32> to vector<16x32xf32>
    %cst_42 = arith.constant dense<0.000000e+00> : vector<16x128xf32>
    %61 = tpu.matmul %60, %58, %cst_42 {dimension_numbers = #tpu.dot_dimension_numbers<[1], [0], [0], [1], [0, 0, 1, 1], [], []>} : vector<16x32xf32>, vector<32x128xf32>, vector<16x128xf32> -> vector<16x128xf32>
    %c2_43 = arith.constant 2 : index
    %c0_44 = arith.constant 0 : index
    %c0_45 = arith.constant 0 : index
    %62 = vector.load %arg5[%c2_43, %c0_44, %c0_45] : memref<3x16x1xf32, #tpu.memory_space<vmem>>, vector<1x16x1xf32>
    %63 = vector.shape_cast %62 : vector<1x16x1xf32> to vector<16x1xf32>
    %64 = vector.broadcast %63 : vector<16x1xf32> to vector<16x128xf32>
    %65 = arith.addf %61, %64 : vector<16x128xf32>
    %66 = vector.extract_strided_slice %65 {offsets = [0, 0], sizes = [8, 128], strides = [1, 1]} : vector<16x128xf32> to vector<8x128xf32>
    %67 = vector.extract_strided_slice %65 {offsets = [8, 0], sizes = [8, 128], strides = [1, 1]} : vector<16x128xf32> to vector<8x128xf32>
    %cst_46 = arith.constant 5.000000e-01 : f32
    %68 = vector.broadcast %cst_46 : f32 to vector<8x128xf32>
    %69 = arith.mulf %68, %67 : vector<8x128xf32>
    %70 = arith.subf %48, %66 : vector<8x128xf32>
    %71 = math.exp %69 : vector<8x128xf32>
    %72 = arith.mulf %70, %71 : vector<8x128xf32>
    %73 = arith.addf %49, %69 : vector<8x128xf32>
    %c0_47 = arith.constant 0 : index
    %c0_48 = arith.constant 0 : index
    %74 = vector.load %arg6[%c0_47, %c0_48] : memref<8x128xf32, #tpu.memory_space<vmem>>, vector<8x128xf32>
    tpu.vector_store %arg6[%c0_47, %c0_48], %72 {strides = array<i32>} : memref<8x128xf32, #tpu.memory_space<vmem>>, vector<8x128xf32>,
    %cst_49 = arith.constant 5.000000e-01 : f32
    %75 = vector.broadcast %cst_49 : f32 to vector<8x128xf32>
    %76 = arith.mulf %75, %72 : vector<8x128xf32>
    %77 = arith.mulf %76, %72 : vector<8x128xf32>
    %78 = arith.subf %73, %77 : vector<8x128xf32>
    %cst_50 = arith.constant dense<0.000000e+00> : vector<128xf32>
    %79 = vector.multi_reduction <add>, %78, %cst_50 [0] : vector<8x128xf32> to vector<128xf32>
    %80 = vector.shape_cast %79 : vector<128xf32> to vector<1x128xf32>
    %c0_51 = arith.constant 0 : index
    %c0_52 = arith.constant 0 : index
    %81 = vector.load %arg7[%c0_51, %c0_52] : memref<1x128xf32, #tpu.memory_space<vmem>>, vector<1x128xf32>
    tpu.vector_store %arg7[%c0_51, %c0_52], %80 {strides = array<i32>} : memref<1x128xf32, #tpu.memory_space<vmem>>, vector<1x128xf32>,
    return
  }
  func.func @transform_0(%arg0: i32) -> (i32, i32) {
    %c0_i32 = arith.constant 0 : i32
    %c0_i32_0 = arith.constant 0 : i32
    return %c0_i32, %arg0 : i32, i32
  }
  func.func @transform_1(%arg0: i32) -> (i32, i32, i32) {
    %c0_i32 = arith.constant 0 : i32
    %c0_i32_0 = arith.constant 0 : i32
    %c0_i32_1 = arith.constant 0 : i32
    %c0_i32_2 = arith.constant 0 : i32
    return %c0_i32, %c0_i32_0, %c0_i32_1 : i32, i32, i32
  }
  func.func @transform_2(%arg0: i32) -> (i32, i32, i32) {
    %c0_i32 = arith.constant 0 : i32
    %c0_i32_0 = arith.constant 0 : i32
    %c0_i32_1 = arith.constant 0 : i32
    %c0_i32_2 = arith.constant 0 : i32
    return %c0_i32, %c0_i32_0, %c0_i32_1 : i32, i32, i32
  }
  func.func @transform_3(%arg0: i32) -> (i32, i32, i32) {
    %c0_i32 = arith.constant 0 : i32
    %c0_i32_0 = arith.constant 0 : i32
    %c0_i32_1 = arith.constant 0 : i32
    %c0_i32_2 = arith.constant 0 : i32
    return %c0_i32, %c0_i32_0, %c0_i32_1 : i32, i32, i32
  }
  func.func @transform_4(%arg0: i32) -> (i32, i32, i32) {
    %c0_i32 = arith.constant 0 : i32
    %c0_i32_0 = arith.constant 0 : i32
    %c0_i32_1 = arith.constant 0 : i32
    %c0_i32_2 = arith.constant 0 : i32
    return %c0_i32, %c0_i32_0, %c0_i32_1 : i32, i32, i32
  }
  func.func @transform_5(%arg0: i32) -> (i32, i32) {
    %c0_i32 = arith.constant 0 : i32
    %c0_i32_0 = arith.constant 0 : i32
    return %c0_i32, %arg0 : i32, i32
  }
  func.func @transform_6(%arg0: i32) -> (i32, i32) {
    %c0_i32 = arith.constant 0 : i32
    %c0_i32_0 = arith.constant 0 : i32
    return %c0_i32, %arg0 : i32, i32
  }
}

</mosaic_0001>

<bundles_post_ra>
// kernel: maf_forward.1
= control target key start
LH: loop header
LB: loop body
LE: loop exit
PB: predicated region body
PF: predicated region fallthrough
CT: control target
= control target key end

     0   :  { %vm51_vm0 = vcmask 64512   ;;  %v474_v0 = vmov 0   ;;  %vm111_vm1 = vcmask 261120   ;;  %s653_s2 = inlined_call_operand.vmem [shape: f32[3,32,1], index: 2, kind: input, shape index: {}]   ;;  %s654_s0 = inlined_call_operand.vmem [shape: f32[8,128], index: 0, kind: input, shape index: {}]   ;;  %s655_s1 = inlined_call_operand.vmem [shape: f32[3,32,8], index: 1, kind: input, shape index: {}]   ;;  %s656_s4 = inlined_call_operand.vmem [shape: f32[3,16,1], index: 4, kind: input, shape index: {}]   ;;  %s657_s3 = inlined_call_operand.vmem [shape: f32[3,16,32], index: 3, kind: input, shape index: {}]   ;;  %s658_s5 = inlined_call_operand.vmem [shape: f32[8,128], index: 5, kind: output, shape index: {0}]   ;;  %s659_s6 = inlined_call_operand.vmem [shape: f32[1,128], index: 6, kind: output, shape index: {1}]  }
   0x1   :  { %465 = vset.pattern.permute.xlu0 %v474_v0  ;;  %466 = vset.pattern.permute.xlu1 %v474_v0  ;;  %v30_v1 = vld [vmem:[%s653_s2 + $0x18] sm:$0xff]  ;;  %v516_v2 = vld [vmem:[%s654_s0] sm:$0xff]  ;;  %v28_v3 = vld [vmem:[%s653_s2 + $0x8] sm:$0xff] }
   0x2   :  { %48 = vperm.xlu0 %465, %v30_v1   ;;  %79 = vmatpush.msra.mxu0 %v516_v2  ;;  %v23_v4 = vld [vmem:[%s655_s1] sm:$0xff]  ;;  %v29_v5 = vld [vmem:[%s653_s2 + $0x10] sm:$0xff]  ;;  %v24_v7 = vld [vmem:[%s655_s1 + $0x8] sm:$0xff] }
   0x3   :  { %38 = vperm.xlu1 %466, %v28_v3   ;;  %418 = vmatmul.msk.f32.vlgmr.msra.gmra.mxu0 %vm51_vm0, %v23_v4  ;;  %v27_v6 = vld [vmem:[%s653_s2] sm:$0xff]  ;;  %v431_v8 = vld [vmem:[%s653_s2 + $0x38] sm:$0xff]  ;;  %v430_v9 = vld [vmem:[%s653_s2 + $0x30] sm:$0xff] }
   0x4   :  { %467 = vset.pattern.permute.xlu2 %v474_v0  ;;  %v25_v10 = vld [vmem:[%s655_s1 + $0x10] sm:$0xff]  ;;  %v428_v11 = vld [vmem:[%s653_s2 + $0x20] sm:$0xff]  ;;  %v439_v12 = vld [vmem:[%s656_s4 + $0x18] sm:$0xff] }
   0x5   :  { %v26_v13 = vld [vmem:[%s655_s1 + $0x18] sm:$0xff]  ;;  %v448_v15 = vld [vmem:[%s653_s2 + $0x50] sm:$0xff]  ;;  %v446_v16 = vld [vmem:[%s653_s2 + $0x40] sm:$0xff] }
   0x6   :  { %v449_v14 = vld [vmem:[%s653_s2 + $0x58] sm:$0xff]  ;;  %v457_v17 = vld [vmem:[%s656_s4 + $0x28] sm:$0xff]  ;;  %v99_v20 = vld [vmem:[%s656_s4] sm:$0xff] }
   0x7   :  { %v100_v18 = vld [vmem:[%s656_s4 + $0x8] sm:$0xff]  ;;  %v438_v26 = vld [vmem:[%s656_s4 + $0x10] sm:$0xff]  ;;  %v97_v40 = vld [vmem:[%s657_s3] sm:$0xff] }
   0x8   :  { %108 = vperm.xlu2 %467, %v100_v18   ;;  %v429_v22 = vld [vmem:[%s653_s2 + $0x28] sm:$0xff]  ;;  %v456_v41 = vld [vmem:[%s656_s4 + $0x20] sm:$0xff]  ;;  %v426_v55 = vld [vmem:[%s655_s1 + $0x30] sm:$0xff] }
   0x9   :  { %v447_v36 = vld [vmem:[%s653_s2 + $0x48] sm:$0xff]  ;;  %v424_v53 = vld [vmem:[%s655_s1 + $0x20] sm:$0xff]  ;;  %v427_v56 = vld [vmem:[%s655_s1 + $0x38] sm:$0xff] }
   0xa   :  { %43 = vperm.xlu0 %465, %v29_v5   ;;  %v98_v39 = vld [vmem:[%s657_s3 + $0x8] sm:$0xff] }
   0xb   :  { %33 = vperm.xlu1 %466, %v27_v6   ;;  %419 = vmatmul.msk.f32.gmra.mxu0 %vm51_vm0, %v24_v7  ;;  %v425_v54 = vld [vmem:[%s655_s1 + $0x28] sm:$0xff] }
  0x10   :  { %103 = vperm.xlu2 %467, %v99_v20  }
  0x12   :  { %174 = vperm.xlu0 %465, %v431_v8  }
  0x13   :  { %169 = vperm.xlu1 %466, %v430_v9   ;;  %420 = vmatmul.msk.f32.gmra.mxu0 %vm51_vm0, %v25_v10  ;;  %v436_v9 = vld [vmem:[%s657_s3 + $0x10] sm:$0xff]  ;;  %v437_v10 = vld [vmem:[%s657_s3 + $0x18] sm:$0xff] }
  0x18   :  { %164 = vperm.xlu2 %467, %v429_v22   ;;  %v442_v22 = vld [vmem:[%s655_s1 + $0x40] sm:$0xff] }
  0x1a   :  { %159 = vperm.xlu0 %465, %v428_v11  }
  0x1b   :  { %235 = vperm.xlu1 %466, %v439_v12   ;;  %421 = vmatmul.msk.f32.gmra.mxu0 %vm51_vm0, %v26_v13 }
  0x20   :  { %230 = vperm.xlu2 %467, %v438_v26  }
  0x22   :  { %300 = vperm.xlu0 %465, %v449_v14  }
  0x23   :  { %295 = vperm.xlu1 %466, %v448_v15  }
  0x28   :  { %290 = vperm.xlu2 %467, %v447_v36  }
  0x2a   :  { %285 = vperm.xlu0 %465, %v446_v16  }
  0x2b   :  { %361 = vperm.xlu1 %466, %v457_v17  }
  0x30   :  { %356 = vperm.xlu2 %467, %v456_v41  }
  0x62   :  { %v109_v42 = vpop.permute.xlu2 %108 }
  0x6a   :  { %v104_v48 = vpop.permute.xlu2 %103 }
  0x72   :  { %v165_v1 = vpop.permute.xlu2 %164 }
  0x74   :  { %v49_v23 = vpop.permute.xlu0 %48 }
  0x75   :  { %v39_v25 = vpop.permute.xlu1 %38 }
  0x7a   :  { %v231_v17 = vpop.permute.xlu2 %230 }
  0x7c   :  { %v44_v27 = vpop.permute.xlu0 %43 }
  0x7d   :  { %v34_v33 = vpop.permute.xlu1 %33 }
  0x80   :  { %v81_v19 = vpop.f32.mrf.mxu0 }
  0x81   :  { %v82_v34 = vadd.f32 %v81_v19, %v34_v33 }
  0x83   :  { %v93_v38 = vmax.f32 %v82_v34, 0.0  ;;  %v291_v34 = vpop.permute.xlu2 %290 }
  0x84   :  { %v175_v60 = vpop.permute.xlu0 %174 }
  0x85   :  { %v170_v61 = vpop.permute.xlu1 %169 }
  0x88   :  { %v84_v21 = vpop.f32.mrf.mxu0 }
  0x89   :  { %v85_v31 = vadd.f32 %v84_v21, %v39_v25  ;;  %v445_v25 = vld [vmem:[%s655_s1 + $0x58] sm:$0xff] }
  0x8b   :  { %v94_v37 = vmax.f32 %v85_v31, 0.0 }
  0x8c   :  { %v160_v4 = vpop.permute.xlu0 %159 }
  0x8d   :  { %v236_v12 = vpop.permute.xlu1 %235 }
  0x90   :  { %v87_v24 = vpop.f32.mrf.mxu0 }
  0x91   :  { %v88_v29 = vadd.f32 %v87_v24, %v44_v27  ;;  %v444_v24 = vld [vmem:[%s655_s1 + $0x50] sm:$0xff] }
  0x93   :  { %v95_v35 = vmax.f32 %v88_v29, 0.0 }
  0x94   :  { %v301_v29 = vpop.permute.xlu0 %300 }
  0x98   :  { %v90_v28 = vpop.f32.mrf.mxu0 }
  0x99   :  { %v91_v30 = vadd.f32 %v90_v28, %v49_v23  ;;  %v443_v23 = vld [vmem:[%s655_s1 + $0x48] sm:$0xff] }
  0x9b   :  { %v96_v32 = vmax.f32 %v91_v30, 0.0  ;;  %v296_v30 = vpop.permute.xlu1 %295 }
  0x9d   :  { %130 = vmatpush.msrb.mxu0 %v96_v32  ;;  %460 = vmatpush.msra.mxu1 %v96_v32 }
  0x9f   :  { %131 = vmatpush.msrb.mxu0 %v95_v35  ;;  %461 = vmatpush.msra.mxu1 %v95_v35 }
  0xa1   :  { %132 = vmatpush.msrb.mxu0 %v94_v37  ;;  %462 = vmatpush.msra.mxu1 %v94_v37  ;;  %v286_v37 = vpop.permute.xlu0 %285 }
  0xa3   :  { %133 = vmatpush.msrb.mxu0 %v93_v38  ;;  %463 = vmatpush.msra.mxu1 %v93_v38 }
  0xa4   :  { %423 = vmatmul.msk.f32.vlgmr.msra.gmra.mxu1 %vm111_vm1, %v98_v39  ;;  %422 = vmatmul.msk.f32.vlgmr.msrb.gmra.mxu0 %vm111_vm1, %v97_v40 }
 0x121   :  { %v138_v43 = vpop.f32.mrf.mxu1  ;;  %v135_v47 = vpop.f32.mrf.mxu0 }
 0x122   :  { %v139_v44 = vadd.f32 %v138_v43, %v109_v42  ;;  %v136_v49 = vadd.f32 %v135_v47, %v104_v48  ;;  %v454_v42 = vld [vmem:[%s657_s3 + $0x20] sm:$0xff]  ;;  %v455_v43 = vld [vmem:[%s657_s3 + $0x28] sm:$0xff] }
 0x124   :  { %v594_v45 = vmul.f32 0.5, %v139_v44  ;;  %v142_v50 = vsub.f32 %v516_v2, %v136_v49 }
 0x126   :  { %v143_v46 = vmul.f32 1.442695, %v594_v45 }
 0x128   :  { %468 = vpow2.f32 %v143_v46  ;;  %v362_v46 = vpop.permute.xlu1 %361 }
 0x12e   :  { %v469_v51 = vpop.eup %468 }
 0x12f   :  { %v145_v52 = vmul.f32 %v469_v51, %v142_v50  ;;  %v357_v51 = vpop.permute.xlu2 %356 }
 0x131   :  { %204 = vmatpush.msra.mxu2 %v145_v52 }
 0x132   :  { %432 = vmatmul.msk.f32.vlgmr.msra.gmra.mxu2 %vm51_vm0, %v424_v53 }
 0x13a   :  { %433 = vmatmul.msk.f32.gmra.mxu2 %vm51_vm0, %v425_v54 }
 0x142   :  { %434 = vmatmul.msk.f32.gmra.mxu2 %vm51_vm0, %v426_v55 }
 0x14a   :  { %435 = vmatmul.msk.f32.gmra.mxu2 %vm51_vm0, %v427_v56 }
 0x1b5   :  { %v206_v57 = vpop.f32.mrf.mxu2 }
 0x1b6   :  { %v207_v5 = vadd.f32 %v206_v57, %v160_v4 }
 0x1b8   :  { %v218_v8 = vmax.f32 %v207_v5, 0.0 }
 0x1bd   :  { %v209_v58 = vpop.f32.mrf.mxu2 }
 0x1be   :  { %v210_v2 = vadd.f32 %v209_v58, %v165_v1 }
 0x1c0   :  { %v219_v7 = vmax.f32 %v210_v2, 0.0 }
 0x1c5   :  { %v212_v59 = vpop.f32.mrf.mxu2 }
 0x1c6   :  { %v213_v63 = vadd.f32 %v212_v59, %v170_v61 }
 0x1c8   :  { %v220_v6 = vmax.f32 %v213_v63, 0.0 }
 0x1cd   :  { %v215_v62 = vpop.f32.mrf.mxu2 }
 0x1ce   :  { %v216_v0 = vadd.f32 %v215_v62, %v175_v60 }
 0x1d0   :  { %v221_v3 = vmax.f32 %v216_v0, 0.0 }
 0x1d2   :  { %256 = vmatpush.msra.mxu3 %v221_v3 }
 0x1d4   :  { %257 = vmatpush.msra.mxu3 %v220_v6 }
 0x1d6   :  { %258 = vmatpush.msra.mxu3 %v219_v7 }
 0x1d8   :  { %259 = vmatpush.msra.mxu3 %v218_v8 }
 0x1d9   :  { %440 = vmatmul.msk.f32.vlgmr.msra.gmra.mxu3 %vm111_vm1, %v436_v9 }
 0x1e1   :  { %441 = vmatmul.msk.f32.gmra.mxu3 %vm111_vm1, %v437_v10 }
 0x25c   :  { %v261_v11 = vpop.f32.mrf.mxu3 }
 0x25d   :  { %v262_v18 = vadd.f32 %v261_v11, %v231_v17 }
 0x25f   :  { %v268_v19 = vsub.f32 %v145_v52, %v262_v18 }
 0x264   :  { %v264_v13 = vpop.f32.mrf.mxu3 }
 0x265   :  { %v265_v14 = vadd.f32 %v264_v13, %v236_v12 }
 0x267   :  { %v267_v15 = vmul.f32 0.5, %v265_v14 }
 0x269   :  { %v269_v16 = vmul.f32 1.442695, %v267_v15  ;;  %v272_v56 = vadd.f32 %v267_v15, %v594_v45 }
 0x26b   :  { %470 = vpow2.f32 %v269_v16 }
 0x271   :  { %v471_v20 = vpop.eup %470 }
 0x272   :  { %v271_v21 = vmul.f32 %v471_v20, %v268_v19 }
 0x274   :  { %330 = vmatpush.msrb.mxu1 %v271_v21 }
 0x275   :  { %450 = vmatmul.msk.f32.vlgmr.msrb.gmra.mxu1 %vm51_vm0, %v442_v22 }
 0x27d   :  { %451 = vmatmul.msk.f32.gmra.mxu1 %vm51_vm0, %v443_v23 }
 0x285   :  { %452 = vmatmul.msk.f32.gmra.mxu1 %vm51_vm0, %v444_v24 }
 0x28d   :  { %453 = vmatmul.msk.f32.gmra.mxu1 %vm51_vm0, %v445_v25 }
 0x2f2   :  { %v332_v26 = vpop.f32.mrf.mxu1 }
 0x2f3   :  { %v333_v38 = vadd.f32 %v332_v26, %v286_v37 }
 0x2f5   :  { %v344_v41 = vmax.f32 %v333_v38, 0.0 }
 0x2fa   :  { %v335_v27 = vpop.f32.mrf.mxu1 }
 0x2fb   :  { %v336_v35 = vadd.f32 %v335_v27, %v291_v34 }
 0x2fd   :  { %v345_v40 = vmax.f32 %v336_v35, 0.0 }
 0x302   :  { %v338_v28 = vpop.f32.mrf.mxu1 }
 0x303   :  { %v339_v32 = vadd.f32 %v338_v28, %v296_v30 }
 0x305   :  { %v346_v39 = vmax.f32 %v339_v32, 0.0 }
 0x30a   :  { %v341_v31 = vpop.f32.mrf.mxu1 }
 0x30b   :  { %v342_v33 = vadd.f32 %v341_v31, %v301_v29 }
 0x30d   :  { %v347_v36 = vmax.f32 %v342_v33, 0.0 }
 0x30f   :  { %382 = vmatpush.msrb.mxu3 %v347_v36 }
 0x311   :  { %383 = vmatpush.msrb.mxu3 %v346_v39 }
 0x313   :  { %384 = vmatpush.msrb.mxu3 %v345_v40 }
 0x315   :  { %385 = vmatpush.msrb.mxu3 %v344_v41 }
 0x316   :  { %458 = vmatmul.msk.f32.vlgmr.msrb.gmra.mxu3 %vm111_vm1, %v454_v42 }
 0x31e   :  { %459 = vmatmul.msk.f32.gmra.mxu3 %vm111_vm1, %v455_v43 }
 0x399   :  { %v387_v44 = vpop.f32.mrf.mxu3 }
 0x39a   :  { %v388_v52 = vadd.f32 %v387_v44, %v357_v51 }
 0x39c   :  { %v394_v53 = vsub.f32 %v271_v21, %v388_v52 }
 0x3a1   :  { %v390_v47 = vpop.f32.mrf.mxu3 }
 0x3a2   :  { %v391_v48 = vadd.f32 %v390_v47, %v362_v46 }
 0x3a4   :  { %v393_v49 = vmul.f32 0.5, %v391_v48 }
 0x3a6   :  { %v395_v50 = vmul.f32 1.442695, %v393_v49  ;;  %v398_v58 = vadd.f32 %v393_v49, %v272_v56 }
 0x3a8   :  { %472 = vpow2.f32 %v395_v50 }
 0x3ae   :  { %v473_v54 = vpop.eup %472 }
 0x3af   :  { %v397_v55 = vmul.f32 %v473_v54, %v394_v53 }
 0x3b1   :  { %399 = vst [vmem:[%s658_s5] sm:$0xff] %v397_v55  ;;  %v400_v57 = vmul.f32 0.5, %v397_v55 }
 0x3b3   :  { %v401_v59 = vmul.f32 %v400_v57, %v397_v55 }
 0x3b5   :  { %v402_v60 = vsub.f32 %v398_v58, %v401_v59 }
 0x3b7   :  { %v403_v61 = vrot.slane %v402_v60, 4 }
 0x3b9   :  { %v404_v62 = vadd.f32 %v403_v61, %v402_v60 }
 0x3bb   :  { %v405_v63 = vrot.slane %v404_v62, 2 }
 0x3bd   :  { %v406_v0 = vadd.f32 %v405_v63, %v404_v62 }
 0x3bf   :  { %v407_v1 = vrot.slane %v406_v0, 1 }
 0x3c1   :  { %v408_v2 = vadd.f32 %v407_v1, %v406_v0 }
 0x3c3   :  { %409 = vst [vmem:[%s659_s6] sm:$0x1] %v408_v2 }

</bundles_post_ra>
